<compile_context>
chip_gen: v5e
topology: v5e:2x2
jax: 0.10.0
libtpu: 0.0.40
codegen_flags: <defaults>
</compile_context>

<pallas_src>
import functools
import math

import jax
import jax.numpy as jnp
from jax import lax
from jax.experimental import pallas as pl
from jax.experimental.pallas import tpu as pltpu


# ----------------------------------------------------------------------------
# Pass 1: per-channel sums of p*g, zpre and zpre^2, accumulated over HW tiles.
# ----------------------------------------------------------------------------
def _cgnl_stats_kernel(x_ref, w_ref, pg_ref, zs_ref, zq_ref, *, cout):
    ti = pl.program_id(1)

    @pl.when(ti == 0)
    def _init():
        pg_ref[...] = jnp.zeros_like(pg_ref)
        zs_ref[...] = jnp.zeros_like(zs_ref)
        zq_ref[...] = jnp.zeros_like(zq_ref)

    x = x_ref[0]                                              # (THW, Cin) native dtype
    # One wide MXU pass:  [p | g | zpre] = x @ [Wp^T | Wg^T | W_tz]
    r = jnp.dot(x, w_ref[...],
                preferred_element_type=jnp.float32)           # (THW, 2*Cout+Cin) f32
    p = r[:, :cout]
    g = r[:, cout:2 * cout]
    zpre = r[:, 2 * cout:]

    pg_ref[0] += jnp.sum(p * g, axis=0, keepdims=True)        # (1, Cout)
    zs_ref[0] += jnp.sum(zpre, axis=0, keepdims=True)         # (1, Cin)
    zq_ref[0] += jnp.sum(zpre * zpre, axis=0, keepdims=True)  # (1, Cin)


# ----------------------------------------------------------------------------
# Pass 2: out = zpre * a + b + x  (attention scale + GroupNorm affine folded
# into the per-channel coefficients a, b), HW-tiled, fully parallel.
# ----------------------------------------------------------------------------
def _cgnl_apply_kernel(x_ref, w_ref, coef_ref, o_ref):
    x = x_ref[0]                                              # (THW, Cin)
    zpre = jnp.dot(x, w_ref[...],
                   preferred_element_type=jnp.float32)        # (THW, Cin) f32
    coef = coef_ref[0]                                        # (2, Cin) f32
    scale = coef[0:1, :]
    shift = coef[1:2, :]
    out = zpre * scale + shift + x.astype(jnp.float32)
    o_ref[0] = out.astype(o_ref.dtype)                        # lane-dense store


def _choose_hw_tile(hw, target=512):
    """Largest tile <= target that is a multiple of 8 and divides hw; falls
    back to `target` (the caller zero-pads HW) or the full extent if small."""
    if hw <= target:
        return hw
    t = (target // 8) * 8
    while t >= 8:
        if hw % t == 0:
            return t
        t -= 8
    return (target // 8) * 8


# ----------------------------------------------------------------------------
# Wrapper: layout conversion, weight folding/fusing, two pallas_calls + glue.
# ----------------------------------------------------------------------------
def spatial_cgnl_pallas(x_nchw, wt, wp, wg, wz, gamma, beta,
                        *, groups=1, use_scale=False, eps=1e-5,
                        hw_tile_target=512):
    """x_nchw: (B, Cin, H, W).  wt/wp/wg: (Cout, Cin) 1x1-conv weights
    (PyTorch layout, 1x1 kernels squeezed).  wz: (Cin, Cout//groups) grouped
    1x1-conv weight.  gamma/beta: (Cin,) GroupNorm affine parameters."""
    b, cin, h, w_sp = x_nchw.shape
    cout = wt.shape[0]
    hw = h * w_sp
    assert cout % groups == 0 and cin % groups == 0
    pc = cout // groups
    ic = cin // groups
    dt = x_nchw.dtype
    f32 = jnp.float32

    # ---- layout: NCHW -> (B, HW, Cin); zero-pad HW to a tile multiple -------
    x_l = jnp.transpose(x_nchw, (0, 2, 3, 1)).reshape(b, hw, cin)
    thw = _choose_hw_tile(hw, hw_tile_target)
    nt = -(-hw // thw)
    hw_pad = nt * thw
    if hw_pad != hw:
        x_l = jnp.pad(x_l, ((0, 0), (0, hw_pad - hw), (0, 0)))

    # ---- weight prep (f32 math, then cast to the input dtype) ---------------
    wt32, wp32, wg32, wz32 = (jnp.asarray(a, f32) for a in (wt, wp, wg, wz))
    # Fold theta-conv + grouped z-conv:  zpre = x @ W_tz ,  z_g = att_g * zpre_g
    wtz_cols = []
    for gi in range(groups):
        wt_g = wt32[gi * pc:(gi + 1) * pc, :]      # (pc, Cin)
        wz_g = wz32[gi * ic:(gi + 1) * ic, :]      # (ic, pc)
        wtz_cols.append(wt_g.T @ wz_g.T)           # (Cin, ic)
    w_tz = jnp.concatenate(wtz_cols, axis=1)       # (Cin, Cin)
    # One fused weight for pass 1:  x @ [Wp^T | Wg^T | W_tz]
    w_stats = jnp.concatenate([wp32.T, wg32.T, w_tz], axis=1).astype(dt)
    w_tz = w_tz.astype(dt)

    cparams_red = pltpu.CompilerParams(
        dimension_semantics=("parallel", "arbitrary"),
        vmem_limit_bytes=48 * 1024 * 1024)
    cparams_par = pltpu.CompilerParams(
        dimension_semantics=("parallel", "parallel"),
        vmem_limit_bytes=48 * 1024 * 1024)

    # ---- pass 1: accumulate per-channel sums over HW tiles ------------------
    stats_kernel = functools.partial(_cgnl_stats_kernel, cout=cout)
    pg_sum, z_sum, zsq_sum = pl.pallas_call(
        stats_kernel,
        out_shape=(jax.ShapeDtypeStruct((b, 1, cout), f32),
                   jax.ShapeDtypeStruct((b, 1, cin), f32),
                   jax.ShapeDtypeStruct((b, 1, cin), f32)),
        grid=(b, nt),
        in_specs=[
            pl.BlockSpec((1, thw, cin), lambda i, t: (i, t, 0)),       # x tile
            pl.BlockSpec((cin, 2 * cout + cin), lambda i, t: (0, 0)),  # fused W
        ],
        out_specs=(
            pl.BlockSpec((1, 1, cout), lambda i, t: (i, 0, 0)),
            pl.BlockSpec((1, 1, cin), lambda i, t: (i, 0, 0)),
            pl.BlockSpec((1, 1, cin), lambda i, t: (i, 0, 0)),
        ),
        compiler_params=cparams_red,
    )(x_l, w_stats)

    # ---- O(B*C) glue: attention scalar + GroupNorm stats -> per-channel coef
    # (zero HW-padding contributes 0 to every sum; true hw is used below)
    att = pg_sum.reshape(b, groups, pc).sum(axis=2)             # (B, G)
    if use_scale:
        att = att * f32(1.0 / math.sqrt(pc * hw))               # precomputed 1/sqrt
    zs_g = z_sum.reshape(b, groups, ic).sum(axis=2)             # (B, G)
    zq_g = zsq_sum.reshape(b, groups, ic).sum(axis=2)           # (B, G)
    n = f32(hw * ic)
    mean = att * zs_g / n                                       # stats of z = att*zpre
    var = att * att * zq_g / n - mean * mean
    rstd = lax.rsqrt(jnp.maximum(var, 0.0) + f32(eps))
    gamma_c = jnp.asarray(gamma, f32)[None, :]                  # (1, Cin)
    beta_c = jnp.asarray(beta, f32)[None, :]
    a_c = jnp.repeat(att * rstd, ic, axis=1) * gamma_c          # (B, Cin)
    b_c = beta_c - jnp.repeat(mean * rstd, ic, axis=1) * gamma_c
    coef = jnp.stack([a_c, b_c], axis=1)                        # (B, 2, Cin) f32

    # ---- pass 2: apply scale + GroupNorm affine + residual ------------------
    out_l = pl.pallas_call(
        _cgnl_apply_kernel,
        out_shape=jax.ShapeDtypeStruct((b, hw_pad, cin), dt),
        grid=(b, nt),
        in_specs=[
            pl.BlockSpec((1, thw, cin), lambda i, t: (i, t, 0)),   # x tile
            pl.BlockSpec((cin, cin), lambda i, t: (0, 0)),         # W_tz
            pl.BlockSpec((1, 2, cin), lambda i, t: (i, 0, 0)),     # coef[b]
        ],
        out_specs=pl.BlockSpec((1, thw, cin), lambda i, t: (i, t, 0)),
        compiler_params=cparams_par,
    )(x_l, w_tz, coef)

    out_l = out_l[:, :hw, :]
    return jnp.transpose(out_l.reshape(b, h, w_sp, cin), (0, 3, 1, 2))


# ----------------------------------------------------------------------------
# Pure-JAX reference (mirrors the PyTorch forward exactly) for verification.
# ----------------------------------------------------------------------------
def spatial_cgnl_ref(x, wt, wp, wg, wz, gamma, beta,
                     *, groups=1, use_scale=False, eps=1e-5):
    b, cin, h, w = x.shape
    cout = wt.shape[0]
    pc = cout // groups
    ic = cin // groups
    conv1x1 = lambda inp, wgt: jnp.einsum('bihw,oi->bohw', inp, wgt)
    t = conv1x1(x, wt)
    p = conv1x1(x, wp)
    g = conv1x1(x, wg)
    outs = []
    for gi in range(groups):
        sl = slice(gi * pc, (gi + 1) * pc)
        att = jnp.sum(p[:, sl] * g[:, sl], axis=(1, 2, 3))        # (b,)
        if use_scale:
            att = att / math.sqrt(pc * h * w)
        outs.append(att[:, None, None, None] * t[:, sl])
    y = jnp.concatenate(outs, axis=1)                             # (b, cout, h, w)
    zouts = []
    for gi in range(groups):
        y_g = y[:, gi * pc:(gi + 1) * pc]
        w_g = wz[gi * ic:(gi + 1) * ic, :]                        # (ic, pc)
        zouts.append(jnp.einsum('bphw,op->bohw', y_g, w_g))
    z = jnp.concatenate(zouts, axis=1)                            # (b, cin, h, w)
    zr = z.reshape(b, groups, ic * h * w)
    mean = zr.mean(axis=2, keepdims=True)
    var = ((zr - mean) ** 2).mean(axis=2, keepdims=True)
    zn = ((zr - mean) / jnp.sqrt(var + eps)).reshape(b, cin, h, w)
    return zn * gamma[None, :, None, None] + beta[None, :, None, None] + x


if __name__ == "__main__":
    def run_case(key, B, Cin, H, W, groups, use_scale):
        Cout = Cin // 2
        kx, kt, kp, kg, kz, kgm, kbt = jax.random.split(key, 7)
        x = jax.random.normal(kx, (B, Cin, H, W), jnp.float32)
        wt = jax.random.normal(kt, (Cout, Cin), jnp.float32) * 0.1
        wp = jax.random.normal(kp, (Cout, Cin), jnp.float32) * 0.1
        wg = jax.random.normal(kg, (Cout, Cin), jnp.float32) * 0.1
        wz = jax.random.normal(kz, (Cin, Cout // groups), jnp.float32) * 0.1
        gamma = 1.0 + 0.1 * jax.random.normal(kgm, (Cin,), jnp.float32)
        beta = 0.1 * jax.random.normal(kbt, (Cin,), jnp.float32)

        out = spatial_cgnl_pallas(x, wt, wp, wg, wz, gamma, beta,
                                  groups=groups, use_scale=use_scale)
        out = jax.block_until_ready(out)
        ref = spatial_cgnl_ref(x, wt, wp, wg, wz, gamma, beta,
                               groups=groups, use_scale=use_scale)
        assert out.shape == (B, Cin, H, W)
        err = float(jnp.max(jnp.abs(out - ref)))
        assert jnp.allclose(out, ref, rtol=1e-4, atol=1e-4), err

    key = jax.random.PRNGKey(0)
    k1, k2 = jax.random.split(key)
    # inplanes=8, planes=4 (planes = inplanes // 2 as SpatialCGNL is used).
    run_case(k1, B=2, Cin=8, H=8, W=8, groups=1, use_scale=False)
    run_case(k2, B=2, Cin=8, H=8, W=8, groups=2, use_scale=True)
    print("KERNEL_OK")
</pallas_src>

<mosaic_0001>
module attributes {stable_mosaic.version = 11 : i64} {
  func.func @_cgnl_stats_kernel(%arg0: i32, %arg1: i32, %arg2: memref<1x64x8xf32, #tpu.memory_space<vmem>>, %arg3: memref<8x16xf32, #tpu.memory_space<vmem>>, %arg4: memref<1x1x4xf32, #tpu.memory_space<vmem>>, %arg5: memref<1x1x8xf32, #tpu.memory_space<vmem>>, %arg6: memref<1x1x8xf32, #tpu.memory_space<vmem>>) attributes {dimension_semantics = [#tpu.dimension_semantics<parallel>, #tpu.dimension_semantics<arbitrary>], iteration_bounds = array<i64: 2, 1>, scalar_prefetch = 0 : i64, scratch_operands = 0 : i64, tpu.core_type = #tpu.core_type<tc>, window_params = [{transform_indices = @transform_0, window_bounds = array<i64: 1, 64, 8>}, {pipeline_mode = #tpu.pipeline_mode<synchronous>, transform_indices = @transform_1, window_bounds = array<i64: 8, 16>}, {transform_indices = @transform_2, window_bounds = array<i64: 1, 1, 4>}, {transform_indices = @transform_3, window_bounds = array<i64: 1, 1, 8>}, {transform_indices = @transform_4, window_bounds = array<i64: 1, 1, 8>}]} {
    %c0_i32 = arith.constant 0 : i32
    %0 = arith.cmpi eq, %arg1, %c0_i32 : i32
    %1 = arith.extui %0 : i1 to i32
    %c0_i32_0 = arith.constant 0 : i32
    %2 = arith.cmpi ne, %1, %c0_i32_0 : i32
    scf.if %2 {
      %cst_26 = arith.constant 0.000000e+00 : f32
      %36 = vector.broadcast %cst_26 : f32 to vector<1x1x4xf32>
      %c0_27 = arith.constant 0 : index
      %c0_28 = arith.constant 0 : index
      %c0_29 = arith.constant 0 : index
      %37 = vector.load %arg4[%c0_27, %c0_28, %c0_29] : memref<1x1x4xf32, #tpu.memory_space<vmem>>, vector<1x1x4xf32>
      tpu.vector_store %arg4[%c0_27, %c0_28, %c0_29], %36 {strides = array<i32>} : memref<1x1x4xf32, #tpu.memory_space<vmem>>, vector<1x1x4xf32>,
      %cst_30 = arith.constant 0.000000e+00 : f32
      %38 = vector.broadcast %cst_30 : f32 to vector<1x1x8xf32>
      %c0_31 = arith.constant 0 : index
      %c0_32 = arith.constant 0 : index
      %c0_33 = arith.constant 0 : index
      %39 = vector.load %arg5[%c0_31, %c0_32, %c0_33] : memref<1x1x8xf32, #tpu.memory_space<vmem>>, vector<1x1x8xf32>
      tpu.vector_store %arg5[%c0_31, %c0_32, %c0_33], %38 {strides = array<i32>} : memref<1x1x8xf32, #tpu.memory_space<vmem>>, vector<1x1x8xf32>,
      %cst_34 = arith.constant 0.000000e+00 : f32
      %40 = vector.broadcast %cst_34 : f32 to vector<1x1x8xf32>
      %c0_35 = arith.constant 0 : index
      %c0_36 = arith.constant 0 : index
      %c0_37 = arith.constant 0 : index
      %41 = vector.load %arg6[%c0_35, %c0_36, %c0_37] : memref<1x1x8xf32, #tpu.memory_space<vmem>>, vector<1x1x8xf32>
      tpu.vector_store %arg6[%c0_35, %c0_36, %c0_37], %40 {strides = array<i32>} : memref<1x1x8xf32, #tpu.memory_space<vmem>>, vector<1x1x8xf32>,
    } else {
    }
    %c0 = arith.constant 0 : index
    %c0_1 = arith.constant 0 : index
    %c0_2 = arith.constant 0 : index
    %3 = vector.load %arg2[%c0, %c0_1, %c0_2] : memref<1x64x8xf32, #tpu.memory_space<vmem>>, vector<1x64x8xf32>
    %4 = vector.shape_cast %3 : vector<1x64x8xf32> to vector<64x8xf32>
    %c0_3 = arith.constant 0 : index
    %c0_4 = arith.constant 0 : index
    %5 = vector.load %arg3[%c0_3, %c0_4] : memref<8x16xf32, #tpu.memory_space<vmem>>, vector<8x16xf32>
    %cst = arith.constant dense<0.000000e+00> : vector<64x16xf32>
    %6 = tpu.matmul %4, %5, %cst {dimension_numbers = #tpu.dot_dimension_numbers<[1], [0], [0], [1], [0, 0, 1, 1], [], []>} : vector<64x8xf32>, vector<8x16xf32>, vector<64x16xf32> -> vector<64x16xf32>
    %7 = vector.extract_strided_slice %6 {offsets = [0, 0], sizes = [64, 4], strides = [1, 1]} : vector<64x16xf32> to vector<64x4xf32>
    %8 = vector.extract_strided_slice %6 {offsets = [0, 4], sizes = [64, 4], strides = [1, 1]} : vector<64x16xf32> to vector<64x4xf32>
    %9 = vector.extract_strided_slice %6 {offsets = [0, 8], sizes = [64, 8], strides = [1, 1]} : vector<64x16xf32> to vector<64x8xf32>
    %c0_5 = arith.constant 0 : index
    %c0_6 = arith.constant 0 : index
    %c0_7 = arith.constant 0 : index
    %10 = vector.load %arg4[%c0_5, %c0_6, %c0_7] : memref<1x1x4xf32, #tpu.memory_space<vmem>>, vector<1x1x4xf32>
    %11 = vector.shape_cast %10 : vector<1x1x4xf32> to vector<1x4xf32>
    %12 = arith.mulf %7, %8 : vector<64x4xf32>
    %cst_8 = arith.constant dense<0.000000e+00> : vector<4xf32>
    %13 = vector.multi_reduction <add>, %12, %cst_8 [0] : vector<64x4xf32> to vector<4xf32>
    %14 = vector.shape_cast %13 : vector<4xf32> to vector<1x4xf32>
    %15 = arith.addf %11, %14 : vector<1x4xf32>
    %c0_9 = arith.constant 0 : index
    %c0_10 = arith.constant 0 : index
    %c0_11 = arith.constant 0 : index
    %16 = vector.load %arg4[%c0_9, %c0_10, %c0_11] : memref<1x1x4xf32, #tpu.memory_space<vmem>>, vector<1x1x4xf32>
    %17 = vector.shape_cast %16 : vector<1x1x4xf32> to vector<1x4xf32>
    %18 = vector.shape_cast %15 : vector<1x4xf32> to vector<1x1x4xf32>
    tpu.vector_store %arg4[%c0_9, %c0_10, %c0_11], %18 {strides = array<i32>} : memref<1x1x4xf32, #tpu.memory_space<vmem>>, vector<1x1x4xf32>,
    %c0_12 = arith.constant 0 : index
    %c0_13 = arith.constant 0 : index
    %c0_14 = arith.constant 0 : index
    %19 = vector.load %arg5[%c0_12, %c0_13, %c0_14] : memref<1x1x8xf32, #tpu.memory_space<vmem>>, vector<1x1x8xf32>
    %20 = vector.shape_cast %19 : vector<1x1x8xf32> to vector<1x8xf32>
    %cst_15 = arith.constant dense<0.000000e+00> : vector<8xf32>
    %21 = vector.multi_reduction <add>, %9, %cst_15 [0] : vector<64x8xf32> to vector<8xf32>
    %22 = vector.shape_cast %21 : vector<8xf32> to vector<1x8xf32>
    %23 = arith.addf %20, %22 : vector<1x8xf32>
    %c0_16 = arith.constant 0 : index
    %c0_17 = arith.constant 0 : index
    %c0_18 = arith.constant 0 : index
    %24 = vector.load %arg5[%c0_16, %c0_17, %c0_18] : memref<1x1x8xf32, #tpu.memory_space<vmem>>, vector<1x1x8xf32>
    %25 = vector.shape_cast %24 : vector<1x1x8xf32> to vector<1x8xf32>
    %26 = vector.shape_cast %23 : vector<1x8xf32> to vector<1x1x8xf32>
    tpu.vector_store %arg5[%c0_16, %c0_17, %c0_18], %26 {strides = array<i32>} : memref<1x1x8xf32, #tpu.memory_space<vmem>>, vector<1x1x8xf32>,
    %c0_19 = arith.constant 0 : index
    %c0_20 = arith.constant 0 : index
    %c0_21 = arith.constant 0 : index
    %27 = vector.load %arg6[%c0_19, %c0_20, %c0_21] : memref<1x1x8xf32, #tpu.memory_space<vmem>>, vector<1x1x8xf32>
    %28 = vector.shape_cast %27 : vector<1x1x8xf32> to vector<1x8xf32>
    %29 = arith.mulf %9, %9 : vector<64x8xf32>
    %cst_22 = arith.constant dense<0.000000e+00> : vector<8xf32>
    %30 = vector.multi_reduction <add>, %29, %cst_22 [0] : vector<64x8xf32> to vector<8xf32>
    %31 = vector.shape_cast %30 : vector<8xf32> to vector<1x8xf32>
    %32 = arith.addf %28, %31 : vector<1x8xf32>
    %c0_23 = arith.constant 0 : index
    %c0_24 = arith.constant 0 : index
    %c0_25 = arith.constant 0 : index
    %33 = vector.load %arg6[%c0_23, %c0_24, %c0_25] : memref<1x1x8xf32, #tpu.memory_space<vmem>>, vector<1x1x8xf32>
    %34 = vector.shape_cast %33 : vector<1x1x8xf32> to vector<1x8xf32>
    %35 = vector.shape_cast %32 : vector<1x8xf32> to vector<1x1x8xf32>
    tpu.vector_store %arg6[%c0_23, %c0_24, %c0_25], %35 {strides = array<i32>} : memref<1x1x8xf32, #tpu.memory_space<vmem>>, vector<1x1x8xf32>,
    return
  }
  func.func @transform_0(%arg0: i32, %arg1: i32) -> (i32, i32, i32) {
    %c0_i32 = arith.constant 0 : i32
    %c0_i32_0 = arith.constant 0 : i32
    return %arg0, %arg1, %c0_i32 : i32, i32, i32
  }
  func.func @transform_1(%arg0: i32, %arg1: i32) -> (i32, i32) {
    %c0_i32 = arith.constant 0 : i32
    %c0_i32_0 = arith.constant 0 : i32
    %c0_i32_1 = arith.constant 0 : i32
    return %c0_i32, %c0_i32_0 : i32, i32
  }
  func.func @transform_2(%arg0: i32, %arg1: i32) -> (i32, i32, i32) {
    %c0_i32 = arith.constant 0 : i32
    %c0_i32_0 = arith.constant 0 : i32
    %c0_i32_1 = arith.constant 0 : i32
    return %arg0, %c0_i32, %c0_i32_0 : i32, i32, i32
  }
  func.func @transform_3(%arg0: i32, %arg1: i32) -> (i32, i32, i32) {
    %c0_i32 = arith.constant 0 : i32
    %c0_i32_0 = arith.constant 0 : i32
    %c0_i32_1 = arith.constant 0 : i32
    return %arg0, %c0_i32, %c0_i32_0 : i32, i32, i32
  }
  func.func @transform_4(%arg0: i32, %arg1: i32) -> (i32, i32, i32) {
    %c0_i32 = arith.constant 0 : i32
    %c0_i32_0 = arith.constant 0 : i32
    %c0_i32_1 = arith.constant 0 : i32
    return %arg0, %c0_i32, %c0_i32_0 : i32, i32, i32
  }
}

</mosaic_0001>

<bundles_post_ra>
// kernel: tpu_custom_call.1
= control target key start
LH: loop header
LB: loop body
LE: loop exit
PB: predicated region body
PF: predicated region fallthrough
CT: control target
= control target key end

     0   :  { %10 = vsyncpa [#allocation3], 0  ;;  %s1163_s0 = inlined_call_operand.vmem [shape: f32[2,64,8], index: 0, kind: input, shape index: {}]   ;;  %s1164_s1 = inlined_call_operand.vmem [shape: f32[8,16], index: 1, kind: input, shape index: {}]   ;;  %s1165_s2 = inlined_call_operand.hbm [shape: f32[2,1,4], index: 2, kind: output, shape index: {0}]   ;;  %s1166_s3 = inlined_call_operand.hbm [shape: f32[2,1,8], index: 3, kind: output, shape index: {1}]   ;;  %s1167_s4 = inlined_call_operand.hbm [shape: f32[2,1,8], index: 4, kind: output, shape index: {2}]  }
   0x1   :  { %12 = vsyncpa [#allocation3 + $0x1], 0 }
   0x2   :  { %13 = vsyncpa [#allocation5], 0 }
   0x3   :  { %15 = vsyncpa [#allocation5 + $0x1], 0  ;;  %s881_s15 = smov 0   ;;  %s883_s16 = smov 0  }
   0x4   :  { %s885_s17 = smov 0   ;;  %s887_s18 = smov 0  }
   0x5   :  { %s889_s19 = smov 0   ;;  %s891_s20 = smov 0  }
   0x6 LB: > { %s624_s21 = sadd.s32 4294967295, %s851_s20   ;;  %s625_s22 = sadd.s32 4294967294, %s851_s20   ;;  %s851_s20 = sphi %s891_s20, %s21_s20   ;;  %s847_s19 = sphi %s889_s19, %s1174_s19   ;;  %s843_s18 = sphi %s887_s18, %s1173_s18   ;;  %s839_s17 = sphi %s885_s17, %s1172_s17   ;;  %s835_s16 = sphi %s883_s16, %s1171_s16   ;;  %s831_s15 = sphi %s881_s15, %s1170_s15  }
   0x7   : > { %s33_s23 = sadd.s32 1, %s847_s19  ;;  %s89_s24 = sadd.s32 1, %s839_s17 }
   0x8   : > { %p35_p0 = scmp.ge.s32.totalorder %s33_s23, 2  ;;  %p99_p1 = scmp.ne.s32.totalorder %s839_s17, %s835_s16 }
   0x9   : > { %p100_p2 = scmp.eq.s32.totalorder %s624_s21, 1  ;;  %p105_p3 = scmp.ne.s32.totalorder %s835_s16, %s831_s15 }
   0xa   : > { %s1176_s23 = smov (%p35_p0, %s33_s23), 0  ;;  %p106_p5 = scmp.eq.s32.totalorder %s625_s22, 1 }
   0xb   : > { %p923_p4 = por %p100_p2, %p99_p1  ;;  %s86_s26 = ssub.s32 %s847_s19, %s1176_s23 }
   0xc   : > { %p628_p6 = scmp.ge.s32.totalorder %s851_s20, 1  ;;  %p87_p7 = scmp.eq.s32.totalorder %s86_s26, 0 }
   0xd   : > { %p932_p8 = por %p106_p5, %p105_p3  ;;  %p192_p9 = scmp.lt.s32.totalorder %s851_s20, 3 }
   0xe   : > { %s938_s28 = scalar_select %p87_p7, %s839_s17, %s89_s24  }
   0xf   : > { %p193_p10 = pnand %p628_p6, %p192_p9 }
  0x10   : > { %p230_p11 = scmp.lt.s32.totalorder (!%p193_p10), %s843_s18, 1  ;;  %s853_s10 = smov (!%p193_p10), 124  }
  0x11   : > { %196 = sbr.rel (%p193_p10) target bundleno = 323 (0x143), region = 28  ;;  %s854_s11 = smov (!%p193_p10), 120  }
  0x12   : > { %s1029_s12 = sand.u32 (!%p193_p10), 1, %s835_s16   ;;  %s485_s30 = scalar_lea.hbm (!%p193_p10), %s1166_s3, %s843_s18 }
  0x13   : > { %s1032_s13 = scalar_lea.vmem (!%p193_p10), [#allocation4], %s1029_s12  ;;  %s1037_s14 = scalar_lea.vmem (!%p193_p10), [#allocation6], %s1029_s12 }
  0x14   : > { %s1042_s24 = scalar_lea.vmem (!%p193_p10), [#allocation2], %s1029_s12  ;;  %s1059_s7 = sshll.u32 (!%p193_p10), %s485_s30, 4  ;;  %s490_s7 = int_to_ptr.hbm [resolvable:$true] %s1059_s7 }
  0x15   : > { %s727_s8 = sshra.s32 (!%p193_p10), %s490_s7, 4  ;;  %s733_s26 = scalar_lea.hbm (!%p193_p10), %s1166_s3, 2  ;;  %s728_s8 = int_to_ptr.hbm [resolvable:$true] %s727_s8 }
  0x16   : > { %v256_v0 = vld [vmem:[%s1164_s1] sm:$0xff]  ;;  %s231_s5 = scalar_select %p230_p11, %s843_s18, 1  ;;  %vm257_vm0 = vcmask 64512   ;;  %vm390_vm1 = vcmask 130112   ;;  %vm245_vm2 = vcmask 57344   ;;  %vm243_vm3 = vcmask 24576  }
  0x17   : > { %297 = vmatpush.msra.mxu0 %v256_v0  ;;  %642 = vmatpush.msra.mxu1 %v256_v0  ;;  %vm364_vm4 = vcmask 31744   ;;  %p734_p1 = scmp.lt.s32.totalorder %s728_s8, %s1166_s3 }
  0x18   : > { %643 = vmatpush.msra.mxu2 %v256_v0  ;;  %644 = vmatpush.msra.mxu3 %v256_v0  ;;  %s641_s6 = sshll.u32 %s231_s5, 6  ;;  %s1053_s5 = sand.u32 1, %s624_s21  }
  0x19   : > { %s237_s9 = scalar_lea.vmem %s1163_s0, %s641_s6  ;;  %s487_s6 = sshll.u32 %s1032_s13, 4  ;;  %s488_s6 = int_to_ptr.vmem [resolvable:$true] %s487_s6 }
  0x1a   : > { %v248_v1 = vld [vmem:[%s237_s9] sm:$0xff]  ;;  %v250_v2 = vld [vmem:[%s237_s9 + $0x10] sm:$0xff]  ;;  %v249_v5 = vld [vmem:[%s237_s9 + $0x8] sm:$0xff]  ;;  %s460_s21 = scalar_lea.sflag [#allocation5], %s1053_s5 }
  0x1b   : > { %v252_v3 = vld [vmem:[%s237_s9 + $0x20] sm:$0xff]  ;;  %631 = vmatmul.msk.f32.vlgmr.msra.gmra.mxu0 %vm257_vm0, %v248_v1  ;;  %633 = vmatmul.msk.f32.vlgmr.msra.gmra.mxu1 %vm257_vm0, %v250_v2  ;;  %v254_v4 = vld [vmem:[%s237_s9 + $0x30] sm:$0xff]  ;;  %v251_v6 = vld [vmem:[%s237_s9 + $0x18] sm:$0xff] }
  0x1c   : > { %635 = vmatmul.msk.f32.vlgmr.msra.gmra.mxu2 %vm257_vm0, %v252_v3  ;;  %637 = vmatmul.msk.f32.vlgmr.msra.gmra.mxu3 %vm257_vm0, %v254_v4  ;;  %v253_v7 = vld [vmem:[%s237_s9 + $0x28] sm:$0xff]  ;;  %v255_v8 = vld [vmem:[%s237_s9 + $0x38] sm:$0xff]  ;;  %v855_v3 = vmov 0.0   ;;  %s729_s9 = scalar_lea.hbm %s728_s8, 1 }
  0x1d   : > { %246 = vst.msk [vmem:[%s1032_s13] sm:$0x1] %vm245_vm2, %v855_v3  ;;  %p730_p12 = scmp.ne.s32.totalorder %s728_s8, %s729_s9  ;;  %p735_p2 = scmp.lt.s32.totalorder %s733_s26, %s729_s9 }
  0x1e   : > { %247 = vst.msk [vmem:[%s1037_s14] sm:$0x1] %vm245_vm2, %v855_v3 }
  0x1f   : > { %244 = vst.msk [vmem:[%s1042_s24] sm:$0x1] %vm243_vm3, %v855_v3  ;;  %p731_p13 = pnand %p730_p12, %p923_p4  ;;  %p736_p3 = por %p735_p2, %p734_p1 }
  0x21   : > { %p732_p0 = pneg %p731_p13 }
  0x23   : > { %632 = vmatmul.msk.f32.gmra.mxu0 %vm257_vm0, %v249_v5  ;;  %634 = vmatmul.msk.f32.gmra.mxu1 %vm257_vm0, %v251_v6  ;;  %p737_p5 = pnand %p736_p3, %p732_p0 }
  0x24   : > { %636 = vmatmul.msk.f32.gmra.mxu2 %vm257_vm0, %v253_v7  ;;  %638 = vmatmul.msk.f32.gmra.mxu3 %vm257_vm0, %v255_v8 }
  0x98   : > { %v956_v9 = vpop.f32.mrf.mxu0  ;;  %v958_v10 = vpop.f32.mrf.mxu1 }
  0x99   : > { %336 = vrot.lane.b32.xlu1 %v958_v10, %s853_s10  ;;  %332 = vrot.lane.b32.xlu0 %v956_v9, %s853_s10  ;;  %v420_v11 = vmul.f32 %v956_v9, %v956_v9  ;;  %v422_v14 = vmul.f32 %v958_v10, %v958_v10  ;;  %v391_v17 = vsel %vm390_vm1, %v956_v9, 0.0  ;;  %v394_v22 = vsel %vm390_vm1, %v958_v10, 0.0 }
  0x9b   : > { %v428_v23 = vsel %vm390_vm1, %v420_v11, 0.0  ;;  %v431_v28 = vsel %vm390_vm1, %v422_v14, 0.0 }
  0x9f   : > { %v966_v12 = vpop.f32.mrf.mxu2  ;;  %v968_v13 = vpop.f32.mrf.mxu3 }
  0xa0   : > { %340 = vrot.lane.b32.xlu2 %v966_v12, %s853_s10  ;;  %v974_v15 = vpop.f32.mrf.mxu0  ;;  %v976_v16 = vpop.f32.mrf.mxu1  ;;  %v424_v29 = vmul.f32 %v966_v12, %v966_v12  ;;  %v398_v33 = vsel %vm390_vm1, %v966_v12, 0.0  ;;  %v426_v41 = vmul.f32 %v968_v13, %v968_v13  ;;  %v402_v46 = vsel %vm390_vm1, %v968_v13, 0.0 }
  0xa1   : > { %v392_v18 = vsel %vm390_vm1, %v974_v15, 0.0  ;;  %v421_v19 = vmul.f32 %v974_v15, %v974_v15  ;;  %v423_v20 = vmul.f32 %v976_v16, %v976_v16  ;;  %338 = vrot.lane.b32.xlu1 %v976_v16, %s853_s10  ;;  %334 = vrot.lane.b32.xlu0 %v974_v15, %s853_s10  ;;  %v396_v25 = vsel %vm390_vm1, %v976_v16, 0.0 }
  0xa2   : > { %v393_v21 = vadd.f32 %v392_v18, %v391_v17  ;;  %v435_v40 = vsel %vm390_vm1, %v424_v29, 0.0  ;;  %v439_v50 = vsel %vm390_vm1, %v426_v41, 0.0 }
  0xa3   : > { %v429_v24 = vsel %vm390_vm1, %v421_v19, 0.0  ;;  %v433_v30 = vsel %vm390_vm1, %v423_v20, 0.0  ;;  %v389_v19 = vld [vmem:[%s1032_s13] sm:$0x1] }
  0xa4   : > { %v430_v26 = vadd.f32 %v429_v24, %v428_v23  ;;  %v395_v27 = vadd.f32 %v394_v22, %v393_v21 }
  0xa6   : > { %v397_v31 = vadd.f32 %v396_v25, %v395_v27  ;;  %v432_v32 = vadd.f32 %v431_v28, %v430_v26 }
  0xa7   : > { %v1002_v34 = vpop.f32.mrf.mxu2  ;;  %v1004_v35 = vpop.f32.mrf.mxu3 }
  0xa8   : > { %v434_v36 = vadd.f32 %v433_v30, %v432_v32  ;;  %v399_v37 = vadd.f32 %v398_v33, %v397_v31  ;;  %v400_v38 = vsel %vm390_vm1, %v1002_v34, 0.0  ;;  %v425_v39 = vmul.f32 %v1002_v34, %v1002_v34  ;;  %342 = vrot.lane.b32.xlu2 %v1002_v34, %s853_s10 }
  0xa9   : > { %v427_v42 = vmul.f32 %v1004_v35, %v1004_v35  ;;  %346 = vrot.lane.b32.xlu1 %v1004_v35, %s853_s10  ;;  %344 = vrot.lane.b32.xlu0 %v968_v13, %s853_s10  ;;  %v404_v47 = vsel %vm390_vm1, %v1004_v35, 0.0 }
  0xaa   : > { %v401_v43 = vadd.f32 %v400_v38, %v399_v37  ;;  %v436_v44 = vadd.f32 %v435_v40, %v434_v36  ;;  %v437_v45 = vsel %vm390_vm1, %v425_v39, 0.0 }
  0xab   : > { %v441_v51 = vsel %vm390_vm1, %v427_v42, 0.0 }
  0xac   : > { %v438_v48 = vadd.f32 %v437_v45, %v436_v44  ;;  %v403_v49 = vadd.f32 %v402_v46, %v401_v43 }
  0xae   : > { %v405_v52 = vadd.f32 %v404_v47, %v403_v49  ;;  %v440_v53 = vadd.f32 %v439_v50, %v438_v48 }
  0xb0   : > { %v406_v54 = vrot.slane %v405_v52, 4  ;;  %v442_v55 = vadd.f32 %v441_v51, %v440_v53 }
  0xb2   : > { %v407_v56 = vadd.f32 %v406_v54, %v405_v52  ;;  %v443_v57 = vrot.slane %v442_v55, 4 }
  0xb4   : > { %v408_v58 = vrot.slane %v407_v56, 2  ;;  %v444_v59 = vadd.f32 %v443_v57, %v442_v55 }
  0xb6   : > { %v409_v60 = vadd.f32 %v408_v58, %v407_v56  ;;  %v445_v61 = vrot.slane %v444_v59, 2 }
  0xb8   : > { %v410_v62 = vrot.slane %v409_v60, 1  ;;  %v446_v63 = vadd.f32 %v445_v61, %v444_v59 }
  0xba   : > { %v411_v0 = vadd.f32 %v410_v62, %v409_v60  ;;  %v447_v1 = vrot.slane %v446_v63, 1 }
  0xbc   : > { %413 = vrot.lane.b32.xlu2 %v411_v0, %s854_s11  ;;  %v448_v2 = vadd.f32 %v447_v1, %v446_v63 }
  0xbe   : > { %450 = vrot.lane.b32.xlu0 %v448_v2, %s854_s11 }
  0xfa   : > { %v341_v4 = vpop.permute.xlu2 %340 }
 0x102   : > { %v343_v7 = vpop.permute.xlu2 %342 }
 0x103   : > { %v361_v26 = vmul.f32 %v343_v7, %v1002_v34 }
 0x10b   : > { %v337_v5 = vpop.permute.xlu1 %336  ;;  %v333_v6 = vpop.permute.xlu0 %332 }
 0x10c   : > { %v356_v8 = vmul.f32 %v333_v6, %v956_v9  ;;  %v358_v17 = vmul.f32 %v337_v5, %v958_v10 }
 0x10e   : > { %v365_v20 = vsel %vm364_vm4, %v356_v8, 0.0  ;;  %v368_v24 = vsel %vm364_vm4, %v358_v17, 0.0 }
 0x113   : > { %v339_v11 = vpop.permute.xlu1 %338  ;;  %v335_v14 = vpop.permute.xlu0 %334 }
 0x114   : > { %v357_v18 = vmul.f32 %v335_v14, %v974_v15  ;;  %v359_v9 = vmul.f32 %v339_v11, %v976_v16  ;;  %v360_v15 = vmul.f32 %v341_v4, %v966_v12 }
 0x116   : > { %v366_v21 = vsel %vm364_vm4, %v357_v18, 0.0  ;;  %v414_v22 = vpop.permute.xlu2 %413  ;;  %v370_v27 = vsel %vm364_vm4, %v359_v9, 0.0 }
 0x117   : > { %v367_v23 = vadd.f32 %v366_v21, %v365_v20  ;;  %v416_v10 = vadd.f32 %v414_v22, %v389_v19 }
 0x119   : > { %v369_v25 = vadd.f32 %v368_v24, %v367_v23  ;;  %418 = vst.msk [vmem:[%s1032_s13] sm:$0x1] %vm245_vm2, %v416_v10 }
 0x11a   : > { %740 = shalt.err (!%p737_p5)
}
 0x11b   : > { %646 = dma.vmem_to_hbm [thread:$0]  (%p923_p4), %s488_s6, 16, %s490_s7, %s460_s21   ;;  %v371_v12 = vadd.f32 %v370_v27, %v369_v25  ;;  %v347_v16 = vpop.permute.xlu1 %346  ;;  %v345_v28 = vpop.permute.xlu0 %344  ;;  %v372_v29 = vsel %vm364_vm4, %v360_v15, 0.0  ;;  %v374_v32 = vsel %vm364_vm4, %v361_v26, 0.0  ;;  %v419_v43 = vld [vmem:[%s1037_s14] sm:$0x1] }
 0x11c   : > { %v362_v30 = vmul.f32 %v345_v28, %v968_v13  ;;  %v363_v33 = vmul.f32 %v347_v16, %v1004_v35  ;;  %s498_s7 = scalar_lea.hbm %s1167_s4, %s843_s18  ;;  %s472_s10 = scalar_lea.hbm %s1165_s2, %s843_s18  ;;  %v323_v44 = vld [vmem:[%s1042_s24] sm:$0x1] }
 0x11d   : > { %v373_v31 = vadd.f32 %v372_v29, %v371_v12  ;;  %s500_s11 = sshll.u32 %s1037_s14, 4  ;;  %s502_s26 = sshll.u32 %s498_s7, 4  ;;  %s501_s11 = int_to_ptr.vmem [resolvable:$true] %s500_s11  ;;  %s503_s26 = int_to_ptr.hbm [resolvable:$true] %s502_s26 }
 0x11e   : > { %v376_v36 = vsel %vm364_vm4, %v362_v30, 0.0  ;;  %v378_v38 = vsel %vm364_vm4, %v363_v33, 0.0  ;;  %s474_s29 = sshll.u32 %s1042_s24, 4  ;;  %s1102_s30 = sshll.u32 %s472_s10, 4  ;;  %s1104_s29 = int_to_ptr.vmem [resolvable:$true] %s474_s29  ;;  %s477_s30 = int_to_ptr.hbm [resolvable:$true] %s1102_s30 }
 0x11f   : > { %v375_v34 = vadd.f32 %v374_v32, %v373_v31  ;;  %s755_s18 = sshra.s32 %s503_s26, 4  ;;  %s761_s8 = scalar_lea.hbm %s1167_s4, 2  ;;  %s756_s18 = int_to_ptr.hbm [resolvable:$true] %s755_s18 }
 0x120   : > { %s757_s13 = scalar_lea.hbm %s756_s18, 1  ;;  %p762_p10 = scmp.lt.s32.totalorder %s756_s18, %s1167_s4 }
 0x121   : > { %v377_v37 = vadd.f32 %v376_v36, %v375_v34  ;;  %p758_p6 = scmp.ne.s32.totalorder %s756_s18, %s757_s13  ;;  %p763_p11 = scmp.lt.s32.totalorder %s761_s8, %s757_s13 }
 0x123   : > { %v379_v39 = vadd.f32 %v378_v38, %v377_v37  ;;  %p759_p7 = pnand %p758_p6, %p923_p4  ;;  %p764_p12 = por %p763_p11, %p762_p10 }
 0x125   : > { %v380_v40 = vrot.slane %v379_v39, 4  ;;  %p760_p9 = pneg %p759_p7 }
 0x127   : > { %v381_v41 = vadd.f32 %v380_v40, %v379_v39  ;;  %p765_p13 = pnand %p764_p12, %p760_p9 }
 0x129   : > { %v382_v42 = vrot.slane %v381_v41, 2 }
 0x12b   : > { %v383_v13 = vadd.f32 %v382_v42, %v381_v41 }
 0x12d   : > { %v384_v35 = vrot.slane %v383_v13, 1 }
 0x12f   : > { %v385_v45 = vadd.f32 %v384_v35, %v383_v13 }
 0x130   : > { %v451_v46 = vpop.permute.xlu0 %450 }
 0x131   : > { %v453_v47 = vadd.f32 %v451_v46, %v419_v43  ;;  %v386_v48 = vadd.f32 %v385_v45, %v323_v44 }
 0x133   : > { %454 = vst.msk [vmem:[%s1037_s14] sm:$0x1] %vm245_vm2, %v453_v47 }
 0x134   : > { %388 = vst.msk [vmem:[%s1042_s24] sm:$0x1] %vm243_vm3, %v386_v48 }
 0x135   : > { %768 = shalt.err (!%p765_p13)
}
 0x136   : > { %647 = dma.vmem_to_hbm [thread:$0]  (%p923_p4), %s501_s11, 16, %s503_s26, %s460_s21  }
 0x137   : > { %s456_s14 = scalar_lea.sflag [#allocation3], %s1029_s12  ;;  %s783_s24 = sshra.s32 %s477_s30, 4  ;;  %s784_s24 = int_to_ptr.hbm [resolvable:$true] %s783_s24 }
 0x138   : > { %s785_s6 = scalar_lea.hbm %s784_s24, 1  ;;  %s789_s7 = scalar_lea.hbm %s1165_s2, 2 }
 0x139   : > { %p786_p0 = scmp.ne.s32.totalorder %s784_s24, %s785_s6  ;;  %p790_p3 = scmp.lt.s32.totalorder %s784_s24, %s1165_s2 }
 0x13a   : > { %p791_p5 = scmp.lt.s32.totalorder %s789_s7, %s785_s6 }
 0x13b   : > { %p787_p1 = pnand %p786_p0, %p923_p4 }
 0x13c   : > { %p792_p6 = por %p791_p5, %p790_p3 }
 0x13d   : > { %p788_p2 = pneg %p787_p1 }
 0x13f   : > { %p793_p7 = pnand %p792_p6, %p788_p2 }
 0x141   : > { %796 = shalt.err (!%p793_p7)
}
 0x142   : > { %645 = dma.vmem_to_hbm [thread:$0]  (%p923_p4), %s1104_s29, 16, %s477_s30, %s456_s14  }
 0x143 PF: > { %p661_p9 = scmp.ge.s32.totalorder %s851_s20, 2  ;;  %s514_s12 = sand.u32 1, %s831_s15  }
 0x144   : > { %s515_s5 = scalar_lea.sflag [#allocation3], %s514_s12 }
 0x145   : > { %p652_p10 = pnand %p661_p9, %p932_p8 }
 0x147   : > { %p653_p11 = pneg %p652_p10 }
 0x149   : > { %822 = dma.done.wait (%p653_p11), %s515_s5, 16  }
 0x14a   : > { %824 = vsyncadd (%p653_p11), %s515_s5, 4294967280  ;;  %s523_s21 = sand.u32 1, %s625_s22  }
 0x14b   : > { %s524_s25 = scalar_lea.sflag [#allocation5], %s523_s21 }
 0x14c   : > { %826 = dma.done.wait (%p653_p11), %s524_s25, 32  }
 0x14d   : > { %828 = vsyncadd (%p653_p11), %s524_s25, 4294967264  ;;  %s21_s20 = sadd.s32 1, %s851_s20   ;;  %s1170_s15 = smov %s835_s16 }
 0x14e   : > { %p18_p4 = scmp.ge.s32.totalorder %s21_s20, 4   ;;  %s1171_s16 = smov %s839_s17 }
 0x14f   : > { %s1172_s17 = smov %s938_s28  ;;  %s1173_s18 = smov %s847_s19 }
 0x150   : > { %s1174_s19 = smov %s1176_s23  ;;  %20 = sbr.rel (!%p18_p4) target bundleno = 6 (0x6), region = 99 }
 0x155   :  { %538 = vsyncpa [#allocation3], 1 }
 0x156   :  { %540 = vsyncpa [#allocation3 + $0x1], 1 }
 0x157   :  { %541 = vsyncpa [#allocation5], 1 }
 0x158   :  { %543 = vsyncpa [#allocation5 + $0x1], 1 }

</bundles_post_ra>
